<compile_context>
chip_gen: v6e
topology: v6e:2x2x1
jax: 0.10.0
libtpu: 0.0.40
codegen_flags: <defaults>
</compile_context>

<pallas_src>
import functools

import jax
import jax.numpy as jnp
from jax.experimental import pallas as pl
from jax.experimental.pallas import tpu as pltpu


def _round_up(n, m):
    return ((n + m - 1) // m) * m


def _default_num_tiles():
    """2 batch tiles on v7x (2 TensorCores/chip), 1 on v5e/v6e (1 TC)."""
    try:
        kind = jax.devices()[0].device_kind.lower()
        if "v7" in kind:
            return 2
    except Exception:
        pass
    return 1


def _dqn_kernel(x_ref, w1_ref, w23_ref, w4_ref, b_ref, b4_ref, o_ref):
    # One batch tile per grid step. All weight/bias BlockSpecs map to block 0 for
    # every grid index, so the ~0.26 MB of bf16 weights are DMA'd once and stay
    # resident in VMEM while activation tiles are pipelined through.
    x = x_ref[...]  # already bf16 (cast + K-padded in the wrapper)

    h = jnp.dot(x, w1_ref[...], preferred_element_type=jnp.float32)
    h = jnp.maximum(h + b_ref[0:1, :], 0.0).astype(jnp.bfloat16)

    h = jnp.dot(h, w23_ref[0], preferred_element_type=jnp.float32)
    h = jnp.maximum(h + b_ref[1:2, :], 0.0).astype(jnp.bfloat16)

    h = jnp.dot(h, w23_ref[1], preferred_element_type=jnp.float32)
    h = jnp.maximum(h + b_ref[2:3, :], 0.0).astype(jnp.bfloat16)

    out = jnp.dot(h, w4_ref[...], preferred_element_type=jnp.float32)
    o_ref[...] = out + b4_ref[...]


def pack_dqn_params(params):
    """Pack the 8 f32 (W, b) tensors into 5 DMA-friendly arrays (done once, reused)."""
    (w1, b1), (w2, b2), (w3, b3), (w4, b4) = params
    state_dim, h = w1.shape
    action_dim = w4.shape[1]

    k = _round_up(state_dim, 8)                            # K-pad 6 -> 8 for bf16 packing
    w1_p = jnp.zeros((k, h), jnp.bfloat16)
    w1_p = w1_p.at[:state_dim, :].set(w1.astype(jnp.bfloat16))   # (8, H)
    w23_p = jnp.stack([w2, w3]).astype(jnp.bfloat16)       # (2, H, H) - one big DMA
    w4_p = w4.astype(jnp.bfloat16)                         # (H, action_dim)
    b123 = jnp.stack([b1, b2, b3]).astype(jnp.float32)     # (3, H) hidden biases
    b4_p = b4.reshape(1, action_dim).astype(jnp.float32)   # (1, action_dim)
    return (w1_p, w23_p, w4_p, b123, b4_p)


@functools.partial(jax.jit, static_argnames=("block_batch", "num_tiles"))
def dqn_forward(x, packed, *, block_batch=1024, num_tiles=1):
    w1, w23, w4, b123, b4 = packed
    batch, state_dim = x.shape
    k, h = w1.shape
    action_dim = w4.shape[1]
    assert state_dim <= k

    # Batch tile: one tile per TensorCore (num_tiles), rounded to the sublane
    # granule, capped at block_batch for very large replay batches.
    pb8 = _round_up(batch, 8)
    tiles = max(int(num_tiles), 1)
    bb = max(8, min(block_batch, _round_up((pb8 + tiles - 1) // tiles, 8)))
    padded_batch = _round_up(batch, bb)

    # Cast + pad in the wrapper (one tiny fused XLA op) so the kernel streams bf16.
    x = x.astype(jnp.bfloat16)
    pad_rows = padded_batch - batch
    pad_cols = k - state_dim
    if pad_rows or pad_cols:
        x = jnp.pad(x, ((0, pad_rows), (0, pad_cols)))

    grid = (padded_batch // bb,)

    flops = 2 * padded_batch * (k * h + 2 * h * h + h * action_dim)
    bytes_accessed = (
        padded_batch * k * 2                         # x (bf16)
        + (k * h + 2 * h * h + h * action_dim) * 2   # weights (bf16)
        + (3 * h + action_dim) * 4                   # biases (f32)
        + padded_batch * action_dim * 4              # output (f32)
    )

    out = pl.pallas_call(
        _dqn_kernel,
        out_shape=jax.ShapeDtypeStruct((padded_batch, action_dim), jnp.float32),
        grid_spec=pltpu.PrefetchScalarGridSpec(
            num_scalar_prefetch=0,
            grid=grid,
            in_specs=[
                pl.BlockSpec((bb, k), lambda i: (i, 0)),          # activations tiled
                pl.BlockSpec((k, h), lambda i: (0, 0)),           # weights VMEM-resident
                pl.BlockSpec((2, h, h), lambda i: (0, 0, 0)),
                pl.BlockSpec((h, action_dim), lambda i: (0, 0)),
                pl.BlockSpec((3, h), lambda i: (0, 0)),
                pl.BlockSpec((1, action_dim), lambda i: (0, 0)),
            ],
            # Last dim == full array dim (action_dim), so the narrow block is legal;
            # masked stores beat streaming a 128-wide, mostly-zero slab + extra slice.
            out_specs=pl.BlockSpec((bb, action_dim), lambda i: (i, 0)),
        ),
        compiler_params=pltpu.CompilerParams(
            dimension_semantics=("parallel",)),   # splits batch tiles across v7x's 2 TCs
        cost_estimate=pl.CostEstimate(
            flops=flops, transcendentals=0, bytes_accessed=bytes_accessed),
    )(x, w1, w23, w4, b123, b4)

    if pad_rows:
        out = out[:batch]
    return out


def init_dqn_params(key, state_dim=6, nb_neurons=256, action_dim=4):
    """Mirror PyTorch nn.Linear default init: U(-1/sqrt(fan_in), 1/sqrt(fan_in)).
    Weights stored as (in_features, out_features)."""
    dims = [(state_dim, nb_neurons),
            (nb_neurons, nb_neurons),
            (nb_neurons, nb_neurons),
            (nb_neurons, action_dim)]
    params = []
    for (fan_in, fan_out) in dims:
        key, kw, kb = jax.random.split(key, 3)
        bound = 1.0 / jnp.sqrt(jnp.float32(fan_in))
        w = jax.random.uniform(kw, (fan_in, fan_out), jnp.float32, -bound, bound)
        b = jax.random.uniform(kb, (fan_out,), jnp.float32, -bound, bound)
        params.append((w, b))
    return params


def dqn_reference(x, params):
    """Plain-JAX reference replicating the kernel's bf16-weight / f32-accumulate math."""
    (w1, b1), (w2, b2), (w3, b3), (w4, b4) = params
    bf = lambda a: a.astype(jnp.bfloat16)
    h = bf(x)
    h = jax.nn.relu(jnp.dot(h, bf(w1), preferred_element_type=jnp.float32) + b1).astype(jnp.bfloat16)
    h = jax.nn.relu(jnp.dot(h, bf(w2), preferred_element_type=jnp.float32) + b2).astype(jnp.bfloat16)
    h = jax.nn.relu(jnp.dot(h, bf(w3), preferred_element_type=jnp.float32) + b3).astype(jnp.bfloat16)
    return jnp.dot(h, bf(w4), preferred_element_type=jnp.float32) + b4


if __name__ == "__main__":
    key = jax.random.PRNGKey(0)
    key, kx = jax.random.split(key)

    # Small, module-consistent shapes: the MLP architecture (6 -> 256x3 -> 4) is
    # fixed by the spec; the batch is a modest replay-buffer mini-batch.
    batch, state_dim, nb_neurons, action_dim = 64, 6, 256, 4
    x = jax.random.normal(kx, (batch, state_dim), jnp.float32)
    params = init_dqn_params(key, state_dim=state_dim,
                             nb_neurons=nb_neurons, action_dim=action_dim)
    packed = pack_dqn_params(params)

    out = dqn_forward(x, packed, num_tiles=_default_num_tiles())
    out = jax.block_until_ready(out)

    ref = dqn_reference(x, params)
    assert out.shape == (batch, action_dim)
    assert jnp.allclose(out, ref, atol=2e-3, rtol=2e-3), \
        float(jnp.max(jnp.abs(out - ref)))

    print("KERNEL_OK")
</pallas_src>

<mosaic_0001>
module attributes {stable_mosaic.version = 11 : i64} {
  func.func @_dqn_kernel(%arg0: i32, %arg1: memref<64x8xbf16, #tpu.memory_space<vmem>>, %arg2: memref<8x256xbf16, #tpu.memory_space<vmem>>, %arg3: memref<2x256x256xbf16, #tpu.memory_space<vmem>>, %arg4: memref<256x4xbf16, #tpu.memory_space<vmem>>, %arg5: memref<3x256xf32, #tpu.memory_space<vmem>>, %arg6: memref<1x4xf32, #tpu.memory_space<vmem>>, %arg7: memref<64x4xf32, #tpu.memory_space<vmem>>) attributes {dimension_semantics = [#tpu.dimension_semantics<parallel>], iteration_bounds = array<i64: 1>, scalar_prefetch = 0 : i64, scratch_operands = 0 : i64, tpu.core_type = #tpu.core_type<tc>, window_params = [{transform_indices = @transform_0, window_bounds = array<i64: 64, 8>}, {pipeline_mode = #tpu.pipeline_mode<synchronous>, transform_indices = @transform_1, window_bounds = array<i64: 8, 256>}, {pipeline_mode = #tpu.pipeline_mode<synchronous>, transform_indices = @transform_2, window_bounds = array<i64: 2, 256, 256>}, {pipeline_mode = #tpu.pipeline_mode<synchronous>, transform_indices = @transform_3, window_bounds = array<i64: 256, 4>}, {pipeline_mode = #tpu.pipeline_mode<synchronous>, transform_indices = @transform_4, window_bounds = array<i64: 3, 256>}, {pipeline_mode = #tpu.pipeline_mode<synchronous>, transform_indices = @transform_5, window_bounds = array<i64: 1, 4>}, {transform_indices = @transform_6, window_bounds = array<i64: 64, 4>}]} {
    %c0 = arith.constant 0 : index
    %c0_0 = arith.constant 0 : index
    %0 = vector.load %arg1[%c0, %c0_0] : memref<64x8xbf16, #tpu.memory_space<vmem>>, vector<64x8xbf16>
    %c0_1 = arith.constant 0 : index
    %c0_2 = arith.constant 0 : index
    %1 = vector.load %arg2[%c0_1, %c0_2] : memref<8x256xbf16, #tpu.memory_space<vmem>>, vector<8x256xbf16>
    %cst = arith.constant dense<0.000000e+00> : vector<64x256xf32>
    %2 = tpu.matmul %0, %1, %cst {dimension_numbers = #tpu.dot_dimension_numbers<[1], [0], [0], [1], [0, 0, 1, 1], [], []>} : vector<64x8xbf16>, vector<8x256xbf16>, vector<64x256xf32> -> vector<64x256xf32>
    %c0_3 = arith.constant 0 : index
    %c0_4 = arith.constant 0 : index
    %3 = vector.load %arg5[%c0_3, %c0_4] : memref<3x256xf32, #tpu.memory_space<vmem>>, vector<1x256xf32>
    %4 = vector.broadcast %3 : vector<1x256xf32> to vector<64x256xf32>
    %5 = arith.addf %2, %4 : vector<64x256xf32>
    %cst_5 = arith.constant 0.000000e+00 : f32
    %6 = vector.broadcast %cst_5 : f32 to vector<64x256xf32>
    %7 = arith.maximumf %5, %6 : vector<64x256xf32>
    %8 = arith.truncf %7 : vector<64x256xf32> to vector<64x256xbf16>
    %c0_6 = arith.constant 0 : index
    %c0_7 = arith.constant 0 : index
    %c0_8 = arith.constant 0 : index
    %9 = vector.load %arg3[%c0_6, %c0_7, %c0_8] : memref<2x256x256xbf16, #tpu.memory_space<vmem>>, vector<1x256x256xbf16>
    %10 = vector.shape_cast %9 : vector<1x256x256xbf16> to vector<256x256xbf16>
    %cst_9 = arith.constant dense<0.000000e+00> : vector<64x256xf32>
    %11 = tpu.matmul %8, %10, %cst_9 {dimension_numbers = #tpu.dot_dimension_numbers<[1], [0], [0], [1], [0, 0, 1, 1], [], []>} : vector<64x256xbf16>, vector<256x256xbf16>, vector<64x256xf32> -> vector<64x256xf32>
    %c1 = arith.constant 1 : index
    %c0_10 = arith.constant 0 : index
    %12 = vector.load %arg5[%c1, %c0_10] : memref<3x256xf32, #tpu.memory_space<vmem>>, vector<1x256xf32>
    %13 = vector.broadcast %12 : vector<1x256xf32> to vector<64x256xf32>
    %14 = arith.addf %11, %13 : vector<64x256xf32>
    %cst_11 = arith.constant 0.000000e+00 : f32
    %15 = vector.broadcast %cst_11 : f32 to vector<64x256xf32>
    %16 = arith.maximumf %14, %15 : vector<64x256xf32>
    %17 = arith.truncf %16 : vector<64x256xf32> to vector<64x256xbf16>
    %c1_12 = arith.constant 1 : index
    %c0_13 = arith.constant 0 : index
    %c0_14 = arith.constant 0 : index
    %18 = vector.load %arg3[%c1_12, %c0_13, %c0_14] : memref<2x256x256xbf16, #tpu.memory_space<vmem>>, vector<1x256x256xbf16>
    %19 = vector.shape_cast %18 : vector<1x256x256xbf16> to vector<256x256xbf16>
    %cst_15 = arith.constant dense<0.000000e+00> : vector<64x256xf32>
    %20 = tpu.matmul %17, %19, %cst_15 {dimension_numbers = #tpu.dot_dimension_numbers<[1], [0], [0], [1], [0, 0, 1, 1], [], []>} : vector<64x256xbf16>, vector<256x256xbf16>, vector<64x256xf32> -> vector<64x256xf32>
    %c2 = arith.constant 2 : index
    %c0_16 = arith.constant 0 : index
    %21 = vector.load %arg5[%c2, %c0_16] : memref<3x256xf32, #tpu.memory_space<vmem>>, vector<1x256xf32>
    %22 = vector.broadcast %21 : vector<1x256xf32> to vector<64x256xf32>
    %23 = arith.addf %20, %22 : vector<64x256xf32>
    %cst_17 = arith.constant 0.000000e+00 : f32
    %24 = vector.broadcast %cst_17 : f32 to vector<64x256xf32>
    %25 = arith.maximumf %23, %24 : vector<64x256xf32>
    %26 = arith.truncf %25 : vector<64x256xf32> to vector<64x256xbf16>
    %c0_18 = arith.constant 0 : index
    %c0_19 = arith.constant 0 : index
    %27 = vector.load %arg4[%c0_18, %c0_19] : memref<256x4xbf16, #tpu.memory_space<vmem>>, vector<256x4xbf16>
    %cst_20 = arith.constant dense<0.000000e+00> : vector<64x4xf32>
    %28 = tpu.matmul %26, %27, %cst_20 {dimension_numbers = #tpu.dot_dimension_numbers<[1], [0], [0], [1], [0, 0, 1, 1], [], []>} : vector<64x256xbf16>, vector<256x4xbf16>, vector<64x4xf32> -> vector<64x4xf32>
    %c0_21 = arith.constant 0 : index
    %c0_22 = arith.constant 0 : index
    %29 = vector.load %arg6[%c0_21, %c0_22] : memref<1x4xf32, #tpu.memory_space<vmem>>, vector<1x4xf32>
    %30 = vector.broadcast %29 : vector<1x4xf32> to vector<64x4xf32>
    %31 = arith.addf %28, %30 : vector<64x4xf32>
    %c0_23 = arith.constant 0 : index
    %c0_24 = arith.constant 0 : index
    %32 = vector.load %arg7[%c0_23, %c0_24] : memref<64x4xf32, #tpu.memory_space<vmem>>, vector<64x4xf32>
    tpu.vector_store %arg7[%c0_23, %c0_24], %31 {strides = array<i32>} : memref<64x4xf32, #tpu.memory_space<vmem>>, vector<64x4xf32>,
    return
  }
  func.func @transform_0(%arg0: i32) -> (i32, i32) {
    %c0_i32 = arith.constant 0 : i32
    %c0_i32_0 = arith.constant 0 : i32
    return %arg0, %c0_i32 : i32, i32
  }
  func.func @transform_1(%arg0: i32) -> (i32, i32) {
    %c0_i32 = arith.constant 0 : i32
    %c0_i32_0 = arith.constant 0 : i32
    %c0_i32_1 = arith.constant 0 : i32
    return %c0_i32, %c0_i32_0 : i32, i32
  }
  func.func @transform_2(%arg0: i32) -> (i32, i32, i32) {
    %c0_i32 = arith.constant 0 : i32
    %c0_i32_0 = arith.constant 0 : i32
    %c0_i32_1 = arith.constant 0 : i32
    %c0_i32_2 = arith.constant 0 : i32
    return %c0_i32, %c0_i32_0, %c0_i32_1 : i32, i32, i32
  }
  func.func @transform_3(%arg0: i32) -> (i32, i32) {
    %c0_i32 = arith.constant 0 : i32
    %c0_i32_0 = arith.constant 0 : i32
    %c0_i32_1 = arith.constant 0 : i32
    return %c0_i32, %c0_i32_0 : i32, i32
  }
  func.func @transform_4(%arg0: i32) -> (i32, i32) {
    %c0_i32 = arith.constant 0 : i32
    %c0_i32_0 = arith.constant 0 : i32
    %c0_i32_1 = arith.constant 0 : i32
    return %c0_i32, %c0_i32_0 : i32, i32
  }
  func.func @transform_5(%arg0: i32) -> (i32, i32) {
    %c0_i32 = arith.constant 0 : i32
    %c0_i32_0 = arith.constant 0 : i32
    %c0_i32_1 = arith.constant 0 : i32
    return %c0_i32, %c0_i32_0 : i32, i32
  }
  func.func @transform_6(%arg0: i32) -> (i32, i32) {
    %c0_i32 = arith.constant 0 : i32
    %c0_i32_0 = arith.constant 0 : i32
    return %arg0, %c0_i32 : i32, i32
  }
}

</mosaic_0001>

<bundles_post_ra>
// kernel: dqn_forward.1
= control target key start
LH: loop header
LB: loop body
LE: loop exit
PB: predicated region body
PF: predicated region fallthrough
CT: control target
= control target key end

     0   :  { %11 = vsyncpa [#allocation3], 0  ;;  %s1314_s21 = smov [#allocation2]   ;;  %s1495_s0 = inlined_call_operand.vmem [shape: bf16[64,8], index: 0, kind: input, shape index: {}]   ;;  %s1496_s1 = inlined_call_operand.vmem [shape: bf16[8,256], index: 1, kind: input, shape index: {}]   ;;  %s1497_s2 = inlined_call_operand.hbm [shape: bf16[2,256,256], index: 2, kind: input, shape index: {}]   ;;  %s1498_s3 = inlined_call_operand.vmem [shape: bf16[256,4], index: 3, kind: input, shape index: {}]   ;;  %s1499_s4 = inlined_call_operand.vmem [shape: f32[3,256], index: 4, kind: input, shape index: {}]   ;;  %s1500_s5 = inlined_call_operand.vmem [shape: f32[1,4], index: 5, kind: input, shape index: {}]   ;;  %s1501_s6 = inlined_call_operand.vmem [shape: f32[64,4], index: 6, kind: output, shape index: {}]  }
   0x1   :  { %s21_s22 = sshll.u32 %s1314_s21, 4  ;;  %s22_s22 = int_to_ptr.vmem [resolvable:$true] %s21_s22 }
   0x2   :  { %s1300_s23 = scalar_lea.vmem %s22_s22, 8192  ;;  %p1305_p1 = scmp.lt.s32.totalorder %s22_s22, %s22_s22 }
   0x3   :  { %p1301_p0 = scmp.ne.s32.totalorder %s22_s22, %s1300_s23  ;;  %p1306_p2 = scmp.lt.s32.totalorder %s1300_s23, %s1300_s23 }
   0x5   :  { %p1307_p3 = por %p1306_p2, %p1305_p1 }
   0x7   :  { %p1308_p4 = pnand %p1307_p3, %p1301_p0 }
   0x9   :  { %1311 = shalt.err (!%p1308_p4)
}
   0xa   :  { %s1315_s24 = smov 128   ;;  %s1316_s25 = smov 8  }
   0xb   :  { %27 = dma.hbm_to_vmem [thread:$0]  %s1497_s2, 8192, %s22_s22, [#allocation3], %s1315_s24, %s1315_s24, %s1316_s25  }
   0xc   :  { %1312 = dma.done.wait [#allocation3], 8192  }
   0xd   :  { %1313 = vsyncadd [#allocation3], 4294959104  ;;  %v1317_v0 = vmov 0   ;;  %v46_v1 = vld [vmem:[%s1496_s1] sm:$0xff]  ;;  %vm97_vm0 = vcmask 1043456   ;;  %vm84_vm1 = vcmask 64512  }
   0xe   :  { %136 = vmatprep.mubr.bf16.mxu0 %v1317_v0  ;;  %v1025_v2 = vcombine.high %v46_v1, %v46_v1  ;;  %v1024_v3 = vcombine.low %v46_v1, %v46_v1  ;;  %v1176_v5 = vld [vmem:[%s1495_s0] sm:$0xff]   ;;  %v1180_v6 = vld [vmem:[#allocation2 + $0x74] ss:$8 sps:$4 sm:$0xff]   ;;  %v1182_v7 = vld [vmem:[#allocation2 + $0x70] ss:$8 sps:$4 sm:$0xff]   ;;  %vm1006_vm2 = vcmask 31744  }
   0xf   :  { %v1183_v8 = vld [vmem:[#allocation2 + $0x64] ss:$8 sps:$4 sm:$0xff]   ;;  %406 = vmatprep.subr.bf16.mxu1 %v1180_v6  ;;  %v1185_v9 = vld [vmem:[#allocation2 + $0x60] ss:$8 sps:$4 sm:$0xff]   ;;  %v1186_v10 = vld [vmem:[#allocation2 + $0x54] ss:$8 sps:$4 sm:$0xff]  }
  0x10   :  { %1026 = vmatprep.subr.msk.bf16.mxu0 %vm97_vm0, %v1025_v2  ;;  %v99_v4 = vsel %vm97_vm0, %v1024_v3, 0  ;;  %407 = vmatpush1.bf16.msra.mxu1 %v1182_v7  ;;  %v1177_v11 = vld [vmem:[%s1495_s0 + $0x8] sm:$0xff]   ;;  %v1188_v12 = vld [vmem:[#allocation2 + $0x50] ss:$8 sps:$4 sm:$0xff]   ;;  %v1192_v15 = vld [vmem:[#allocation2 + $0x34] ss:$8 sps:$4 sm:$0xff]   ;;  %v49_v3 = vlaneseq }
  0x11   :  { %119 = vmatpush1.bf16.msra.mxu0 %v99_v4  ;;  %408 = vmatprep.subr.bf16.mxu1 %v1183_v8  ;;  %v1189_v13 = vld [vmem:[#allocation2 + $0x44] ss:$8 sps:$4 sm:$0xff]   ;;  %v1191_v14 = vld [vmem:[#allocation2 + $0x40] ss:$8 sps:$4 sm:$0xff]   ;;  %v1178_v16 = vld [vmem:[%s1495_s0 + $0x10] sm:$0xff]  }
  0x12   :  { %v1194_v17 = vld [vmem:[#allocation2 + $0x30] ss:$8 sps:$4 sm:$0xff]   ;;  %v1195_v18 = vld [vmem:[#allocation2 + $0x24] ss:$8 sps:$4 sm:$0xff]   ;;  %v1197_v19 = vld [vmem:[#allocation2 + $0x20] ss:$8 sps:$4 sm:$0xff]  }
  0x13   :  { %v1198_v20 = vld [vmem:[#allocation2 + $0x14] ss:$8 sps:$4 sm:$0xff]   ;;  %v1200_v22 = vld [vmem:[#allocation2 + $0x10] ss:$8 sps:$4 sm:$0xff]   ;;  %v1201_v23 = vld [vmem:[#allocation2 + $0x4] ss:$8 sps:$4 sm:$0xff]  }
  0x14   :  { %1027 = vmatmul.mubr.msk.bf16.vlgmr.msra.gmra.mxu0 %vm84_vm1, %v1176_v5  ;;  %409 = vmatpush1.bf16.msra.mxu1 %v1185_v9  ;;  %v1179_v21 = vld [vmem:[%s1495_s0 + $0x18] sm:$0xff]   ;;  %v1203_v24 = vld [vmem:[#allocation2] ss:$8 sps:$4 sm:$0xff]   ;;  %v1207_v27 = vld [vmem:[#allocation2 + $0xe4] ss:$8 sps:$4 sm:$0xff]   ;;  %v50_v4 = vshrl.u32 %v49_v3, 7 }
  0x15   :  { %146 = vmatprep.mubr.bf16.mxu0 %v1317_v0  ;;  %410 = vmatprep.subr.bf16.mxu1 %v1186_v10  ;;  %v1204_v25 = vld [vmem:[#allocation2 + $0xf4] ss:$8 sps:$4 sm:$0xff]   ;;  %v1206_v26 = vld [vmem:[#allocation2 + $0xf0] ss:$8 sps:$4 sm:$0xff]   ;;  %v1209_v28 = vld [vmem:[#allocation2 + $0xe0] ss:$8 sps:$4 sm:$0xff]  }
  0x16   :  { %v1210_v29 = vld [vmem:[#allocation2 + $0xd4] ss:$8 sps:$4 sm:$0xff]   ;;  %v1212_v30 = vld [vmem:[#allocation2 + $0xd0] ss:$8 sps:$4 sm:$0xff]   ;;  %v1213_v31 = vld [vmem:[#allocation2 + $0xc4] ss:$8 sps:$4 sm:$0xff]  }
  0x17   :  { %v1215_v32 = vld [vmem:[#allocation2 + $0xc0] ss:$8 sps:$4 sm:$0xff]   ;;  %v1216_v33 = vld [vmem:[#allocation2 + $0xb4] ss:$8 sps:$4 sm:$0xff]   ;;  %v1218_v34 = vld [vmem:[#allocation2 + $0xb0] ss:$8 sps:$4 sm:$0xff]  }
  0x18   :  { %411 = vmatpush1.bf16.msra.mxu1 %v1188_v12  ;;  %v1219_v35 = vld [vmem:[#allocation2 + $0xa4] ss:$8 sps:$4 sm:$0xff]   ;;  %v1221_v36 = vld [vmem:[#allocation2 + $0xa0] ss:$8 sps:$4 sm:$0xff]   ;;  %v1222_v37 = vld [vmem:[#allocation2 + $0x94] ss:$8 sps:$4 sm:$0xff]  }
  0x19   :  { %412 = vmatprep.subr.bf16.mxu1 %v1189_v13  ;;  %v1224_v38 = vld [vmem:[#allocation2 + $0x90] ss:$8 sps:$4 sm:$0xff]   ;;  %v1225_v39 = vld [vmem:[#allocation2 + $0x84] ss:$8 sps:$4 sm:$0xff]   ;;  %v1227_v40 = vld [vmem:[#allocation2 + $0x80] ss:$8 sps:$4 sm:$0xff]  }
  0x1a   :  { %v1228_v41 = vld [vmem:[#allocation2 + $0x170] ss:$8 sps:$4 sm:$0xff]   ;;  %v1230_v42 = vld [vmem:[#allocation2 + $0x174] ss:$8 sps:$4 sm:$0xff]   ;;  %v1233_v43 = vld [vmem:[#allocation2 + $0x164] ss:$8 sps:$4 sm:$0xff]  }
  0x1b   :  { %709 = vmatprep.subr.bf16.mxu0 %v1230_v42  ;;  %v1231_v44 = vld [vmem:[#allocation2 + $0x160] ss:$8 sps:$4 sm:$0xff]   ;;  %v1236_v45 = vld [vmem:[#allocation2 + $0x154] ss:$8 sps:$4 sm:$0xff]   ;;  %v1234_v46 = vld [vmem:[#allocation2 + $0x150] ss:$8 sps:$4 sm:$0xff]  }
  0x1c   :  { %1028 = vmatmul.mubr.msk.bf16.gmra.mxu0 %vm84_vm1, %v1177_v11  ;;  %413 = vmatpush1.bf16.msra.mxu1 %v1191_v14  ;;  %v1239_v47 = vld [vmem:[#allocation2 + $0x144] ss:$8 sps:$4 sm:$0xff]   ;;  %v1237_v48 = vld [vmem:[#allocation2 + $0x140] ss:$8 sps:$4 sm:$0xff]   ;;  %v1242_v49 = vld [vmem:[#allocation2 + $0x134] ss:$8 sps:$4 sm:$0xff]  }
  0x1d   :  { %156 = vmatprep.mubr.bf16.mxu0 %v1317_v0  ;;  %414 = vmatprep.subr.bf16.mxu1 %v1192_v15  ;;  %v1240_v50 = vld [vmem:[#allocation2 + $0x130] ss:$8 sps:$4 sm:$0xff]   ;;  %v1245_v51 = vld [vmem:[#allocation2 + $0x124] ss:$8 sps:$4 sm:$0xff]   ;;  %v1243_v52 = vld [vmem:[#allocation2 + $0x120] ss:$8 sps:$4 sm:$0xff]  }
  0x1e   :  { %710 = vmatpush1.bf16.msra.mxu0 %v1228_v41  ;;  %v1248_v53 = vld [vmem:[#allocation2 + $0x114] ss:$8 sps:$4 sm:$0xff]   ;;  %v1246_v54 = vld [vmem:[#allocation2 + $0x110] ss:$8 sps:$4 sm:$0xff]   ;;  %v1251_v55 = vld [vmem:[#allocation2 + $0x104] ss:$8 sps:$4 sm:$0xff]  }
  0x1f   :  { %711 = vmatprep.subr.bf16.mxu0 %v1233_v43  ;;  %v1249_v56 = vld [vmem:[#allocation2 + $0x100] ss:$8 sps:$4 sm:$0xff]   ;;  %v1254_v57 = vld [vmem:[#allocation2 + $0x1f4] ss:$8 sps:$4 sm:$0xff]   ;;  %v1252_v58 = vld [vmem:[#allocation2 + $0x1f0] ss:$8 sps:$4 sm:$0xff]  }
  0x20   :  { %415 = vmatpush1.bf16.msra.mxu1 %v1194_v17  ;;  %v1257_v59 = vld [vmem:[#allocation2 + $0x1e4] ss:$8 sps:$4 sm:$0xff]   ;;  %v1255_v60 = vld [vmem:[#allocation2 + $0x1e0] ss:$8 sps:$4 sm:$0xff]   ;;  %v1260_v61 = vld [vmem:[#allocation2 + $0x1d4] ss:$8 sps:$4 sm:$0xff]  }
  0x21   :  { %416 = vmatprep.subr.bf16.mxu1 %v1195_v18  ;;  %v1258_v62 = vld [vmem:[#allocation2 + $0x1d0] ss:$8 sps:$4 sm:$0xff]   ;;  %v1263_v63 = vld [vmem:[#allocation2 + $0x1c4] ss:$8 sps:$4 sm:$0xff]   ;;  %v1266_v1 = vld [vmem:[#allocation2 + $0x1b4] ss:$8 sps:$4 sm:$0xff]  }
  0x22   :  { %712 = vmatpush1.bf16.msra.mxu0 %v1231_v44  ;;  %v1264_v2 = vld [vmem:[#allocation2 + $0x1b0] ss:$8 sps:$4 sm:$0xff]   ;;  %v1375_v5 = vsub.s32 1, %v50_v4  ;;  %v1377_v6 = vsub.s32 0, %v50_v4  ;;  %v1267_v3 = vld [vmem:[#allocation2 + $0x1a0] ss:$8 sps:$4 sm:$0xff]  }
  0x23   :  { %713 = vmatprep.subr.bf16.mxu0 %v1236_v45  ;;  %v47_v7 = vld [vmem:[%s1499_s4] ss:$4 sm:$0x3]  ;;  %v1272_v4 = vld [vmem:[#allocation2 + $0x194] ss:$8 sps:$4 sm:$0xff]  }
  0x24   :  { %1029 = vmatmul.mubr.msk.bf16.gmra.mxu0 %vm84_vm1, %v1178_v16  ;;  %417 = vmatpush1.bf16.msra.mxu1 %v1197_v19  ;;  %v56_v9 = vrot.slane %v47_v7, %v1375_v5  ;;  %v52_v10 = vrot.slane %v47_v7, %v1377_v6  ;;  %v1270_v7 = vld [vmem:[#allocation2 + $0x190] ss:$8 sps:$4 sm:$0xff]  }
  0x25   :  { %166 = vmatprep.mubr.bf16.mxu0 %v1317_v0  ;;  %418 = vmatprep.subr.bf16.mxu1 %v1198_v20  ;;  %v1261_v0 = vld [vmem:[#allocation2 + $0x1c0] ss:$8 sps:$4 sm:$0xff]  }
  0x26   :  { %714 = vmatpush1.bf16.msra.mxu0 %v1234_v46 }
  0x27   :  { %715 = vmatprep.subr.bf16.mxu0 %v1239_v47 }
  0x28   :  { %419 = vmatpush1.bf16.msra.mxu1 %v1200_v22 }
  0x29   :  { %420 = vmatprep.subr.bf16.mxu1 %v1201_v23 }
  0x2a   :  { %716 = vmatpush1.bf16.msra.mxu0 %v1237_v48 }
  0x2b   :  { %717 = vmatprep.subr.bf16.mxu0 %v1242_v49 }
  0x2c   :  { %1030 = vmatmul.mubr.msk.bf16.gmra.mxu0 %vm84_vm1, %v1179_v21  ;;  %421 = vmatpush1.bf16.msra.mxu1 %v1203_v24 }
  0x2d   :  { %422 = vmatprep.subr.bf16.mxu1 %v1204_v25 }
  0x2e   :  { %718 = vmatpush1.bf16.msra.mxu0 %v1240_v50 }
  0x2f   :  { %719 = vmatprep.subr.bf16.mxu0 %v1245_v51 }
  0x30   :  { %423 = vmatpush2.bf16.msra.mxu1 %v1206_v26 }
  0x31   :  { %424 = vmatprep.subr.bf16.mxu1 %v1207_v27 }
  0x32   :  { %720 = vmatpush1.bf16.msra.mxu0 %v1243_v52 }
  0x33   :  { %721 = vmatprep.subr.bf16.mxu0 %v1248_v53 }
  0x34   :  { %425 = vmatpush2.bf16.msra.mxu1 %v1209_v28 }
  0x35   :  { %426 = vmatprep.subr.bf16.mxu1 %v1210_v29 }
  0x36   :  { %722 = vmatpush1.bf16.msra.mxu0 %v1246_v54 }
  0x37   :  { %723 = vmatprep.subr.bf16.mxu0 %v1251_v55 }
  0x38   :  { %427 = vmatpush2.bf16.msra.mxu1 %v1212_v30 }
  0x39   :  { %428 = vmatprep.subr.bf16.mxu1 %v1213_v31 }
  0x3a   :  { %724 = vmatpush1.bf16.msra.mxu0 %v1249_v56 }
  0x3b   :  { %725 = vmatprep.subr.bf16.mxu0 %v1254_v57 }
  0x3c   :  { %429 = vmatpush2.bf16.msra.mxu1 %v1215_v32 }
  0x3d   :  { %430 = vmatprep.subr.bf16.mxu1 %v1216_v33 }
  0x3e   :  { %726 = vmatpush2.bf16.msra.mxu0 %v1252_v58 }
  0x3f   :  { %727 = vmatprep.subr.bf16.mxu0 %v1257_v59 }
  0x40   :  { %431 = vmatpush2.bf16.msra.mxu1 %v1218_v34 }
  0x41   :  { %432 = vmatprep.subr.bf16.mxu1 %v1219_v35 }
  0x42   :  { %728 = vmatpush2.bf16.msra.mxu0 %v1255_v60 }
  0x43   :  { %729 = vmatprep.subr.bf16.mxu0 %v1260_v61 }
  0x44   :  { %433 = vmatpush2.bf16.msra.mxu1 %v1221_v36 }
  0x45   :  { %434 = vmatprep.subr.bf16.mxu1 %v1222_v37 }
  0x46   :  { %730 = vmatpush2.bf16.msra.mxu0 %v1258_v62 }
  0x47   :  { %731 = vmatprep.subr.bf16.mxu0 %v1263_v63 }
  0x48   :  { %435 = vmatpush2.bf16.msra.mxu1 %v1224_v38 }
  0x49   :  { %436 = vmatprep.subr.bf16.mxu1 %v1225_v39 }
  0x4a   :  { %732 = vmatpush2.bf16.msra.mxu0 %v1261_v0 }
  0x4b   :  { %733 = vmatprep.subr.bf16.mxu0 %v1266_v1 }
  0x4c   :  { %437 = vmatpush2.bf16.msra.mxu1 %v1227_v40 }
  0x4e   :  { %734 = vmatpush2.bf16.msra.mxu0 %v1264_v2  ;;  %v1269_v2 = vld [vmem:[#allocation2 + $0x1a4] ss:$8 sps:$4 sm:$0xff]  }
  0x4f   :  { %735 = vmatprep.subr.bf16.mxu0 %v1269_v2 }
  0x52   :  { %736 = vmatpush2.bf16.msra.mxu0 %v1267_v3 }
  0x53   :  { %737 = vmatprep.subr.bf16.mxu0 %v1272_v4 }
  0x56   :  { %738 = vmatpush2.bf16.msra.mxu0 %v1270_v7 }
  0xd4   :  { %v138_v8 = vpop.f32.mrf.mxu0 }
  0xd5   :  { %v139_v15 = vadd.f32 %v138_v8, %v52_v10  ;;  %v1275_v8 = vld [vmem:[#allocation2 + $0x184] ss:$8 sps:$4 sm:$0xff]  }
  0xd6   :  { %v140_v11 = vpop.f32.mrf.mxu0  ;;  %739 = vmatprep.subr.bf16.mxu0 %v1275_v8 }
  0xd7   :  { %v141_v13 = vadd.f32 %v140_v11, %v56_v9  ;;  %v177_v22 = vmax.f32 %v139_v15, 0.0  ;;  %v1277_v11 = vld [vmem:[%s1498_s3 + $0x38] sm:$0xff]   ;;  %v1281_v15 = vld [vmem:[%s1498_s3 + $0x28] sm:$0xff]  }
  0xd8   :  { %v142_v12 = vpop.f32.mrf.mxu0 }
  0xd9   :  { %v143_v14 = vadd.f32 %v142_v12, %v52_v10  ;;  %v178_v20 = vmax.f32 %v141_v13, 0.0  ;;  %v1278_v12 = vld [vmem:[%s1498_s3 + $0x70] sm:$0xff]  }
  0xda   :  { %v144_v16 = vpop.f32.mrf.mxu0  ;;  %v1279_v13 = vld [vmem:[%s1498_s3 + $0x30] sm:$0xff]  }
  0xdb   :  { %v145_v17 = vadd.f32 %v144_v16, %v56_v9  ;;  %v179_v18 = vmax.f32 %v143_v14, 0.0  ;;  %v1280_v14 = vld [vmem:[%s1498_s3 + $0x68] sm:$0xff]   ;;  %v1282_v16 = vld [vmem:[%s1498_s3 + $0x60] sm:$0xff]  }
  0xdc   :  { %v148_v19 = vpop.f32.mrf.mxu0 }
  0xdd   :  { %v180_v21 = vmax.f32 %v145_v17, 0.0  ;;  %v193_v25 = vpack.c.bf16 %v179_v18, %v177_v22  ;;  %v149_v29 = vadd.f32 %v148_v19, %v52_v10  ;;  %v1283_v17 = vld [vmem:[%s1498_s3 + $0x20] sm:$0xff]   ;;  %v1411_v18 = vld [vmem:[%s1498_s3 + $0x58] sm:$0xff]  }
  0xde   :  { %v150_v23 = vpop.f32.mrf.mxu0  ;;  %v1417_v19 = vld [vmem:[%s1498_s3 + $0x18] sm:$0xff]  }
  0xdf   :  { %v194_v24 = vpack.c.bf16 %v180_v21, %v178_v20  ;;  %v151_v27 = vadd.f32 %v150_v23, %v56_v9  ;;  %v181_v36 = vmax.f32 %v149_v29, 0.0  ;;  %v1031_v20 = vld [vmem:[%s1499_s4 + $0x1] ss:$4 sm:$0x3] }
  0xe0   :  { %v152_v26 = vpop.f32.mrf.mxu0  ;;  %v1424_v22 = vrot.slane %v1031_v20, %v1375_v5  ;;  %v239_v23 = vrot.slane %v1031_v20, %v1377_v6  ;;  %v1289_v20 = vld [vmem:[%s1498_s3 + $0x8] sm:$0xff]  }
  0xe1   :  { %v153_v28 = vadd.f32 %v152_v26, %v52_v10  ;;  %438 = vmatprep.mubr.bf16.mxu1 %v194_v24  ;;  %v182_v34 = vmax.f32 %v151_v27, 0.0 }
  0xe2   :  { %v154_v30 = vpop.f32.mrf.mxu0  ;;  %439 = vmatmul.mubr.bf16.vlgmr.msra.gmra.mxu1 %v193_v25 }
  0xe3   :  { %v155_v31 = vadd.f32 %v154_v30, %v56_v9  ;;  %v183_v32 = vmax.f32 %v153_v28, 0.0 }
  0xe4   :  { %v158_v33 = vpop.f32.mrf.mxu0 }
  0xe5   :  { %v184_v35 = vmax.f32 %v155_v31, 0.0  ;;  %v195_v39 = vpack.c.bf16 %v183_v32, %v181_v36  ;;  %v159_v43 = vadd.f32 %v158_v33, %v52_v10 }
  0xe6   :  { %v160_v37 = vpop.f32.mrf.mxu0 }
  0xe7   :  { %v196_v38 = vpack.c.bf16 %v184_v35, %v182_v34  ;;  %v161_v41 = vadd.f32 %v160_v37, %v56_v9  ;;  %v185_v50 = vmax.f32 %v159_v43, 0.0 }
  0xe8   :  { %v162_v40 = vpop.f32.mrf.mxu0 }
  0xe9   :  { %v163_v42 = vadd.f32 %v162_v40, %v52_v10  ;;  %448 = vmatprep.mubr.bf16.mxu1 %v196_v38  ;;  %v186_v48 = vmax.f32 %v161_v41, 0.0 }
  0xea   :  { %v164_v44 = vpop.f32.mrf.mxu0  ;;  %449 = vmatmul.mubr.bf16.gmra.mxu1 %v195_v39 }
  0xeb   :  { %v165_v45 = vadd.f32 %v164_v44, %v56_v9  ;;  %v187_v46 = vmax.f32 %v163_v42, 0.0 }
  0xec   :  { %v168_v47 = vpop.f32.mrf.mxu0 }
  0xed   :  { %v188_v49 = vmax.f32 %v165_v45, 0.0  ;;  %v197_v53 = vpack.c.bf16 %v187_v46, %v185_v50  ;;  %v169_v57 = vadd.f32 %v168_v47, %v52_v10 }
  0xee   :  { %v170_v51 = vpop.f32.mrf.mxu0 }
  0xef   :  { %v198_v52 = vpack.c.bf16 %v188_v49, %v186_v48  ;;  %v171_v55 = vadd.f32 %v170_v51, %v56_v9  ;;  %v189_v63 = vmax.f32 %v169_v57, 0.0 }
  0xf0   :  { %v172_v54 = vpop.f32.mrf.mxu0 }
  0xf1   :  { %v173_v56 = vadd.f32 %v172_v54, %v52_v10  ;;  %458 = vmatprep.mubr.bf16.mxu1 %v198_v52  ;;  %v190_v61 = vmax.f32 %v171_v55, 0.0  ;;  %v1273_v10 = vld [vmem:[#allocation2 + $0x180] ss:$8 sps:$4 sm:$0xff]  }
  0xf2   :  { %v174_v58 = vpop.f32.mrf.mxu0  ;;  %459 = vmatmul.mubr.bf16.gmra.mxu1 %v197_v53  ;;  %740 = vmatpush2.bf16.msra.mxu0 %v1273_v10 }
  0xf3   :  { %v175_v59 = vadd.f32 %v174_v58, %v56_v9  ;;  %v191_v60 = vmax.f32 %v173_v56, 0.0  ;;  %v1276_v9 = vld [vmem:[%s1498_s3 + $0x78] sm:$0xff]  }
  0xf4   :  { %1114 = vmatprep.subr.bf16.mxu0 %v1276_v9  ;;  %1154 = vmatprep.subr.bf16.mxu1 %v1276_v9 }
  0xf5   :  { %v192_v62 = vmax.f32 %v175_v59, 0.0  ;;  %v199_v1 = vpack.c.bf16 %v191_v60, %v189_v63  ;;  %1162 = vmatpush3.bf16.msra.mxu1 %v1277_v11 }
  0xf6   :  { %1155 = vmatprep.subr.bf16.mxu1 %v1278_v12 }
  0xf7   :  { %v200_v0 = vpack.c.bf16 %v192_v62, %v190_v61 }
  0xf9   :  { %468 = vmatprep.mubr.bf16.mxu1 %v200_v0  ;;  %1163 = vmatpush3.bf16.msra.mxu1 %v1279_v13 }
  0xfa   :  { %469 = vmatmul.mubr.bf16.gmra.mxu1 %v199_v1  ;;  %1156 = vmatprep.subr.bf16.mxu1 %v1280_v14 }
  0xfd   :  { %1164 = vmatpush3.bf16.msra.mxu1 %v1281_v15 }
  0xfe   :  { %1157 = vmatprep.subr.bf16.mxu1 %v1282_v16 }
 0x101   :  { %1165 = vmatpush3.bf16.msra.mxu1 %v1283_v17 }
 0x102   :  { %1158 = vmatprep.subr.bf16.mxu1 %v1411_v18 }
 0x105   :  { %1166 = vmatpush3.bf16.msra.mxu1 %v1417_v19 }
 0x1a2   :  { %v440_v21 = vpop.f32.mrf.mxu1 }
 0x1a3   :  { %v441_v28 = vadd.f32 %v440_v21, %v239_v23  ;;  %v1290_v21 = vld [vmem:[%s1498_s3 + $0x40] sm:$0xff]  }
 0x1a4   :  { %v442_v24 = vpop.f32.mrf.mxu1 }
 0x1a5   :  { %v443_v26 = vadd.f32 %v442_v24, %v1424_v22  ;;  %v479_v35 = vmax.f32 %v441_v28, 0.0 }
 0x1a6   :  { %v444_v25 = vpop.f32.mrf.mxu1 }
 0x1a7   :  { %v445_v27 = vadd.f32 %v444_v25, %v239_v23  ;;  %v480_v33 = vmax.f32 %v443_v26, 0.0 }
 0x1a8   :  { %v446_v29 = vpop.f32.mrf.mxu1 }
 0x1a9   :  { %v447_v30 = vadd.f32 %v446_v29, %v1424_v22  ;;  %v481_v31 = vmax.f32 %v445_v27, 0.0 }
 0x1aa   :  { %v450_v32 = vpop.f32.mrf.mxu1 }
 0x1ab   :  { %v482_v34 = vmax.f32 %v447_v30, 0.0  ;;  %v495_v38 = vpack.c.bf16 %v481_v31, %v479_v35  ;;  %v451_v42 = vadd.f32 %v450_v32, %v239_v23 }
 0x1ac   :  { %v452_v36 = vpop.f32.mrf.mxu1 }
 0x1ad   :  { %v496_v37 = vpack.c.bf16 %v482_v34, %v480_v33  ;;  %v453_v40 = vadd.f32 %v452_v36, %v1424_v22  ;;  %v483_v49 = vmax.f32 %v451_v42, 0.0 }
 0x1ae   :  { %v454_v39 = vpop.f32.mrf.mxu1 }
 0x1af   :  { %v455_v41 = vadd.f32 %v454_v39, %v239_v23  ;;  %741 = vmatprep.mubr.bf16.mxu0 %v496_v37  ;;  %v484_v47 = vmax.f32 %v453_v40, 0.0 }
 0x1b0   :  { %v456_v43 = vpop.f32.mrf.mxu1  ;;  %742 = vmatmul.mubr.bf16.vlgmr.msra.gmra.mxu0 %v495_v38 }
 0x1b1   :  { %v457_v44 = vadd.f32 %v456_v43, %v1424_v22  ;;  %1115 = vmatpush3.bf16.msra.mxu0 %v1277_v11  ;;  %v485_v45 = vmax.f32 %v455_v41, 0.0 }
 0x1b2   :  { %v460_v46 = vpop.f32.mrf.mxu1  ;;  %1116 = vmatprep.subr.bf16.mxu0 %v1278_v12 }
 0x1b3   :  { %v486_v48 = vmax.f32 %v457_v44, 0.0  ;;  %v497_v52 = vpack.c.bf16 %v485_v45, %v483_v49  ;;  %v461_v56 = vadd.f32 %v460_v46, %v239_v23 }
 0x1b4   :  { %v462_v50 = vpop.f32.mrf.mxu1 }
 0x1b5   :  { %v498_v51 = vpack.c.bf16 %v486_v48, %v484_v47  ;;  %1117 = vmatpush3.bf16.msra.mxu0 %v1279_v13  ;;  %v463_v54 = vadd.f32 %v462_v50, %v1424_v22  ;;  %v487_v63 = vmax.f32 %v461_v56, 0.0 }
 0x1b6   :  { %v464_v53 = vpop.f32.mrf.mxu1  ;;  %1118 = vmatprep.subr.bf16.mxu0 %v1280_v14 }
 0x1b7   :  { %v465_v55 = vadd.f32 %v464_v53, %v239_v23  ;;  %751 = vmatprep.mubr.bf16.mxu0 %v498_v51  ;;  %v488_v61 = vmax.f32 %v463_v54, 0.0 }
 0x1b8   :  { %v466_v57 = vpop.f32.mrf.mxu1  ;;  %752 = vmatmul.mubr.bf16.gmra.mxu0 %v497_v52 }
 0x1b9   :  { %v467_v58 = vadd.f32 %v466_v57, %v1424_v22  ;;  %1119 = vmatpush3.bf16.msra.mxu0 %v1281_v15  ;;  %v489_v59 = vmax.f32 %v465_v55, 0.0 }
 0x1ba   :  { %v470_v60 = vpop.f32.mrf.mxu1  ;;  %1120 = vmatprep.subr.bf16.mxu0 %v1282_v16 }
 0x1bb   :  { %v490_v62 = vmax.f32 %v467_v58, 0.0  ;;  %v499_v2 = vpack.c.bf16 %v489_v59, %v487_v63  ;;  %v471_v8 = vadd.f32 %v470_v60, %v239_v23 }
 0x1bc   :  { %v472_v0 = vpop.f32.mrf.mxu1 }
 0x1bd   :  { %v500_v1 = vpack.c.bf16 %v490_v62, %v488_v61  ;;  %1121 = vmatpush3.bf16.msra.mxu0 %v1283_v17  ;;  %v473_v4 = vadd.f32 %v472_v0, %v1424_v22  ;;  %v491_v14 = vmax.f32 %v471_v8, 0.0  ;;  %v1286_v17 = vld [vmem:[%s1498_s3 + $0x50] sm:$0xff]  }
 0x1be   :  { %v474_v3 = vpop.f32.mrf.mxu1  ;;  %1122 = vmatprep.subr.bf16.mxu0 %v1411_v18  ;;  %v1287_v18 = vld [vmem:[%s1498_s3 + $0x10] sm:$0xff]   ;;  %1159 = vmatprep.subr.bf16.mxu1 %v1286_v17 }
 0x1bf   :  { %v475_v7 = vadd.f32 %v474_v3, %v239_v23  ;;  %761 = vmatprep.mubr.bf16.mxu0 %v500_v1  ;;  %v492_v12 = vmax.f32 %v473_v4, 0.0  ;;  %1167 = vmatpush3.bf16.msra.mxu1 %v1287_v18  ;;  %v1064_v23 = vld [vmem:[%s1499_s4 + $0x2] ss:$4 sm:$0x3] }
 0x1c0   :  { %v476_v10 = vpop.f32.mrf.mxu1  ;;  %762 = vmatmul.mubr.bf16.gmra.mxu0 %v499_v2  ;;  %v546_v25 = vrot.slane %v1064_v23, %v1375_v5  ;;  %v542_v26 = vrot.slane %v1064_v23, %v1377_v6 }
 0x1c1   :  { %v477_v9 = vadd.f32 %v476_v10, %v1424_v22  ;;  %1123 = vmatpush3.bf16.msra.mxu0 %v1417_v19  ;;  %v493_v11 = vmax.f32 %v475_v7, 0.0  ;;  %v1288_v19 = vld [vmem:[%s1498_s3 + $0x48] sm:$0xff]   ;;  %v1291_v22 = vld [vmem:[%s1498_s3] sm:$0xff]  }
 0x1c2   :  { %1124 = vmatprep.subr.bf16.mxu0 %v1286_v17  ;;  %1160 = vmatprep.subr.bf16.mxu1 %v1288_v19 }
 0x1c3   :  { %v494_v13 = vmax.f32 %v477_v9, 0.0  ;;  %v501_v16 = vpack.c.bf16 %v493_v11, %v491_v14  ;;  %1168 = vmatpush3.bf16.msra.mxu1 %v1289_v20 }
 0x1c4   :  { %1161 = vmatprep.subr.bf16.mxu1 %v1290_v21 }
 0x1c5   :  { %v502_v15 = vpack.c.bf16 %v494_v13, %v492_v12  ;;  %1125 = vmatpush3.bf16.msra.mxu0 %v1287_v18 }
 0x1c6   :  { %1126 = vmatprep.subr.bf16.mxu0 %v1288_v19  ;;  %v1097_v19 = vld [vmem:[%s1500_s5] ss:$0 sm:$0xff] }
 0x1c7   :  { %771 = vmatprep.mubr.bf16.mxu0 %v502_v15  ;;  %1169 = vmatpush3.bf16.msra.mxu1 %v1291_v22 }
 0x1c8   :  { %772 = vmatmul.mubr.bf16.gmra.mxu0 %v501_v16 }
 0x1c9   :  { %1127 = vmatpush3.bf16.msra.mxu0 %v1289_v20 }
 0x1ca   :  { %1128 = vmatprep.subr.bf16.mxu0 %v1290_v21 }
 0x1cd   :  { %1129 = vmatpush3.bf16.msra.mxu0 %v1291_v22 }
 0x270   :  { %v743_v24 = vpop.f32.mrf.mxu0 }
 0x271   :  { %v744_v31 = vadd.f32 %v743_v24, %v542_v26 }
 0x272   :  { %v745_v27 = vpop.f32.mrf.mxu0 }
 0x273   :  { %v746_v29 = vadd.f32 %v745_v27, %v546_v25  ;;  %v782_v38 = vmax.f32 %v744_v31, 0.0 }
 0x274   :  { %v747_v28 = vpop.f32.mrf.mxu0 }
 0x275   :  { %v748_v30 = vadd.f32 %v747_v28, %v542_v26  ;;  %v783_v36 = vmax.f32 %v746_v29, 0.0 }
 0x276   :  { %v749_v32 = vpop.f32.mrf.mxu0 }
 0x277   :  { %v750_v33 = vadd.f32 %v749_v32, %v546_v25  ;;  %v784_v34 = vmax.f32 %v748_v30, 0.0 }
 0x278   :  { %v753_v35 = vpop.f32.mrf.mxu0 }
 0x279   :  { %v785_v37 = vmax.f32 %v750_v33, 0.0  ;;  %v798_v41 = vpack.c.bf16 %v784_v34, %v782_v38  ;;  %v754_v6 = vadd.f32 %v753_v35, %v542_v26 }
 0x27a   :  { %v755_v39 = vpop.f32.mrf.mxu0 }
 0x27b   :  { %v799_v40 = vpack.c.bf16 %v785_v37, %v783_v36  ;;  %v756_v43 = vadd.f32 %v755_v39, %v546_v25  ;;  %v786_v50 = vmax.f32 %v754_v6, 0.0 }
 0x27c   :  { %v757_v42 = vpop.f32.mrf.mxu0 }
 0x27d   :  { %v758_v5 = vadd.f32 %v757_v42, %v542_v26  ;;  %973 = vmatprep.mubr.bf16.mxu0 %v799_v40  ;;  %v787_v48 = vmax.f32 %v756_v43, 0.0 }
 0x27e   :  { %v759_v44 = vpop.f32.mrf.mxu0  ;;  %974 = vmatmul.mubr.bf16.vlgmr.msra.gmra.mxu0 %v798_v41 }
 0x27f   :  { %v760_v45 = vadd.f32 %v759_v44, %v546_v25  ;;  %v788_v46 = vmax.f32 %v758_v5, 0.0 }
 0x280   :  { %v763_v47 = vpop.f32.mrf.mxu0 }
 0x281   :  { %v789_v49 = vmax.f32 %v760_v45, 0.0  ;;  %v800_v53 = vpack.c.bf16 %v788_v46, %v786_v50  ;;  %v764_v57 = vadd.f32 %v763_v47, %v542_v26 }
 0x282   :  { %v765_v51 = vpop.f32.mrf.mxu0 }
 0x283   :  { %v801_v52 = vpack.c.bf16 %v789_v49, %v787_v48  ;;  %v766_v55 = vadd.f32 %v765_v51, %v546_v25  ;;  %v790_v0 = vmax.f32 %v764_v57, 0.0 }
 0x284   :  { %v767_v54 = vpop.f32.mrf.mxu0 }
 0x285   :  { %v768_v56 = vadd.f32 %v767_v54, %v542_v26  ;;  %981 = vmatprep.mubr.bf16.mxu1 %v801_v52  ;;  %v791_v62 = vmax.f32 %v766_v55, 0.0 }
 0x286   :  { %v769_v58 = vpop.f32.mrf.mxu0  ;;  %982 = vmatmul.mubr.bf16.vlgmr.msra.gmra.mxu1 %v800_v53 }
 0x287   :  { %v770_v59 = vadd.f32 %v769_v58, %v546_v25  ;;  %v792_v60 = vmax.f32 %v768_v56, 0.0 }
 0x288   :  { %v773_v61 = vpop.f32.mrf.mxu0 }
 0x289   :  { %v793_v63 = vmax.f32 %v770_v59, 0.0  ;;  %v802_v3 = vpack.c.bf16 %v792_v60, %v790_v0  ;;  %v774_v10 = vadd.f32 %v773_v61, %v542_v26 }
 0x28a   :  { %v775_v1 = vpop.f32.mrf.mxu0 }
 0x28b   :  { %v803_v2 = vpack.c.bf16 %v793_v63, %v791_v62  ;;  %v776_v7 = vadd.f32 %v775_v1, %v546_v25  ;;  %v794_v15 = vmax.f32 %v774_v10, 0.0 }
 0x28c   :  { %v777_v4 = vpop.f32.mrf.mxu0 }
 0x28d   :  { %v778_v8 = vadd.f32 %v777_v4, %v542_v26  ;;  %989 = vmatprep.mubr.bf16.mxu1 %v803_v2  ;;  %v795_v13 = vmax.f32 %v776_v7, 0.0 }
 0x28e   :  { %v779_v9 = vpop.f32.mrf.mxu0  ;;  %990 = vmatmul.mubr.bf16.gmra.mxu1 %v802_v3 }
 0x28f   :  { %v780_v11 = vadd.f32 %v779_v9, %v546_v25  ;;  %v796_v12 = vmax.f32 %v778_v8, 0.0 }
 0x291   :  { %v797_v14 = vmax.f32 %v780_v11, 0.0  ;;  %v804_v17 = vpack.c.bf16 %v796_v12, %v794_v15 }
 0x293   :  { %v805_v16 = vpack.c.bf16 %v797_v14, %v795_v13 }
 0x295   :  { %997 = vmatprep.mubr.bf16.mxu1 %v805_v16 }
 0x296   :  { %998 = vmatmul.mubr.bf16.gmra.mxu1 %v804_v17 }
 0x33e   :  { %v1130_v18 = vpop.f32.mrf.mxu0 }
 0x340   :  { %v1131_v20 = vpop.f32.mrf.mxu0 }
 0x341   :  { %v1132_v21 = vadd.f32 %v1131_v20, %v1130_v18 }
 0x342   :  { %v1133_v22 = vpop.f32.mrf.mxu0 }
 0x343   :  { %v976_v23 = vadd.f32 %v1132_v21, %v1097_v19 }
 0x344   :  { %v1134_v24 = vpop.f32.mrf.mxu0 }
 0x345   :  { %1007 = vst.msk [vmem:[%s1501_s6] sm:$0xff] %vm1006_vm2, %v976_v23  ;;  %v1135_v25 = vadd.f32 %v1134_v24, %v1133_v22 }
 0x346   :  { %v1136_v26 = vpop.f32.mrf.mxu1 }
 0x347   :  { %v979_v27 = vadd.f32 %v1135_v25, %v1097_v19 }
 0x348   :  { %v1137_v28 = vpop.f32.mrf.mxu1 }
 0x349   :  { %1008 = vst.msk [vmem:[%s1501_s6 + $0x8] sm:$0xff] %vm1006_vm2, %v979_v27  ;;  %v1138_v29 = vadd.f32 %v1137_v28, %v1136_v26 }
 0x34a   :  { %v1139_v30 = vpop.f32.mrf.mxu1 }
 0x34b   :  { %v984_v31 = vadd.f32 %v1138_v29, %v1097_v19 }
 0x34c   :  { %v1140_v32 = vpop.f32.mrf.mxu1 }
 0x34d   :  { %1009 = vst.msk [vmem:[%s1501_s6 + $0x10] sm:$0xff] %vm1006_vm2, %v984_v31  ;;  %v1141_v33 = vadd.f32 %v1140_v32, %v1139_v30 }
 0x34e   :  { %v1142_v34 = vpop.f32.mrf.mxu1 }
 0x34f   :  { %v987_v35 = vadd.f32 %v1141_v33, %v1097_v19 }
 0x350   :  { %v1143_v36 = vpop.f32.mrf.mxu1 }
 0x351   :  { %1010 = vst.msk [vmem:[%s1501_s6 + $0x18] sm:$0xff] %vm1006_vm2, %v987_v35  ;;  %v1144_v37 = vadd.f32 %v1143_v36, %v1142_v34 }
 0x352   :  { %v1145_v38 = vpop.f32.mrf.mxu1 }
 0x353   :  { %v992_v39 = vadd.f32 %v1144_v37, %v1097_v19 }
 0x354   :  { %v1146_v40 = vpop.f32.mrf.mxu1 }
 0x355   :  { %1011 = vst.msk [vmem:[%s1501_s6 + $0x20] sm:$0xff] %vm1006_vm2, %v992_v39  ;;  %v1147_v41 = vadd.f32 %v1146_v40, %v1145_v38 }
 0x356   :  { %v1148_v42 = vpop.f32.mrf.mxu1 }
 0x357   :  { %v995_v43 = vadd.f32 %v1147_v41, %v1097_v19 }
 0x358   :  { %v1149_v5 = vpop.f32.mrf.mxu1 }
 0x359   :  { %1012 = vst.msk [vmem:[%s1501_s6 + $0x28] sm:$0xff] %vm1006_vm2, %v995_v43  ;;  %v1150_v6 = vadd.f32 %v1149_v5, %v1148_v42 }
 0x35a   :  { %v1151_v44 = vpop.f32.mrf.mxu1 }
 0x35b   :  { %v1000_v45 = vadd.f32 %v1150_v6, %v1097_v19 }
 0x35c   :  { %v1152_v46 = vpop.f32.mrf.mxu1 }
 0x35d   :  { %1013 = vst.msk [vmem:[%s1501_s6 + $0x30] sm:$0xff] %vm1006_vm2, %v1000_v45  ;;  %v1153_v47 = vadd.f32 %v1152_v46, %v1151_v44 }
 0x35f   :  { %v1003_v48 = vadd.f32 %v1153_v47, %v1097_v19 }
 0x361   :  { %1014 = vst.msk [vmem:[%s1501_s6 + $0x38] sm:$0xff] %vm1006_vm2, %v1003_v48 }
 0x362   :  { %1019 = vsyncpa [#allocation3], 1 }

</bundles_post_ra>
